<compile_context>
chip_gen: v5e
topology: v5e:2x2
jax: 0.10.0
libtpu: 0.0.40
codegen_flags: <defaults>
</compile_context>

<pallas_src>
import numpy as np
import jax
import jax.numpy as jnp
from jax.experimental import pallas as pl
from jax.experimental.pallas import tpu as pltpu

_LANES = 128
_SUBLANES = 8
_Q = 9
_N_FIELDS = 8          # rho, E, T, qx, qy, Rxx, Rxy, Ryy
_MIN_TILES = 8         # target >= 8 grid steps (keeps both v7x TCs fed)


def _round_up(x, m):
    return (x + m - 1) // m * m


def _round_down(x, m):
    return (x // m) * m


def _axpy(acc, coef, vec):
    """acc + coef*vec with trace-time folding for coef in {0, +1, -1}."""
    if coef == 0.0:
        return acc
    if coef == 1.0:
        return acc + vec
    if coef == -1.0:
        return acc - vec
    return acc + coef * vec


def _hoisted_invariants(rho, E, T, qx, qy, Rxx, Rxy, Ryy):
    """q-invariant quantities, computed once per spatial tile."""
    invT = 1.0 / T                       # one divide per tile
    inv2T2 = 0.5 * invT * invT           # 1 / (2*T^2)
    two_rho_E = 2.0 * rho * E
    corr = two_rho_E * T
    A = (Rxx - corr) * inv2T2            # coeff of ex^2
    B = (Ryy - corr) * inv2T2            # coeff of ey^2
    Rm = Rxy * inv2T2                    # coeff of ex*ey
    Sx = qx * invT                       # coeff of ex
    Sy = qy * invT                       # coeff of ey
    base = two_rho_E - T * (A + B)       # term1 + the (-T) pieces of term3
    return base, Sx, Sy, A, B, Rm


def _make_static_kernel(w_vals, ex_vals, ey_vals):
    """Kernel with w/ex/ey baked as compile-time constants (D2Q9: ex,ey in {0,±1})."""

    def kernel(rho_ref, E_ref, T_ref, qx_ref, qy_ref,
               Rxx_ref, Rxy_ref, Ryy_ref, out_ref):
        base, Sx, Sy, A, B, Rm = _hoisted_invariants(
            rho_ref[...], E_ref[...], T_ref[...],
            qx_ref[...], qy_ref[...],
            Rxx_ref[...], Rxy_ref[...], Ryy_ref[...])
        for q in range(_Q):
            wq = float(w_vals[q])
            exq = float(ex_vals[q])
            eyq = float(ey_vals[q])
            g = base
            g = _axpy(g, exq, Sx)
            g = _axpy(g, eyq, Sy)
            g = _axpy(g, exq * exq, A)
            g = _axpy(g, eyq * eyq, B)
            g = _axpy(g, exq * eyq, Rm)
            out_ref[q] = wq * g

    return kernel


def _dynamic_kernel(w_ref, ex_ref, ey_ref,
                    rho_ref, E_ref, T_ref, qx_ref, qy_ref,
                    Rxx_ref, Rxy_ref, Ryy_ref, out_ref):
    """Fallback when w/ex/ey are traced: per-direction scalars live in SMEM."""
    base, Sx, Sy, A, B, Rm = _hoisted_invariants(
        rho_ref[...], E_ref[...], T_ref[...],
        qx_ref[...], qy_ref[...],
        Rxx_ref[...], Rxy_ref[...], Ryy_ref[...])
    for q in range(_Q):
        wq = w_ref[q]
        exq = ex_ref[q]
        eyq = ey_ref[q]
        g = (base + exq * Sx + eyq * Sy
             + (exq * exq) * A + (eyq * eyq) * B + (exq * eyq) * Rm)
        out_ref[q] = wq * g


def _concrete_f32(x, n):
    """Concrete numpy view of x (shape (n,)) or None if it is a tracer."""
    try:
        return np.asarray(jax.device_get(x), dtype=np.float32).reshape(n)
    except Exception:
        return None


def _vmem_capacity_bytes():
    try:
        info = pltpu.get_tpu_info()
        cap = getattr(info, "vmem_capacity_bytes", None)
        if cap:
            return int(cap)
    except Exception:
        pass
    return 64 << 20  # v7x per-TC size: safe lower bound for all generations


def _choose_layout(N, block_rows, lane_cols, vmem_budget):
    """Pick (C, R, TR, aligned).

    aligned=True  -> (H,W) fields reshape to (R,C) for free, R*C == N.
    aligned=False -> fields need padding to R*C >= N (ragged N only).
    """
    lane_cols = max(_LANES, _round_down(lane_cols, _LANES))
    aligned = (N % _LANES == 0)
    if aligned:
        # Largest multiple of 128 that divides N, capped at lane_cols.
        C = _LANES
        c = 2 * _LANES
        while c <= min(lane_cols, N):
            if N % c == 0:
                C = c
            c += _LANES
        R = N // C
    else:
        C = min(lane_cols, _round_up(N, _LANES))
        R = pl.cdiv(N, C)

    if R <= _SUBLANES:
        TR = R  # single full-height block (block dim == full array dim)
    else:
        # VMEM: double-buffered inputs + double-buffered 9-plane output
        # + ~8 blocks of compiler scratch for the hoisted invariants.
        per_row_bytes = (2 * _N_FIELDS + 2 * _Q + 8) * C * 4
        tr_vmem = max(_SUBLANES,
                      _round_down(max(vmem_budget // per_row_bytes, _SUBLANES),
                                  _SUBLANES))
        # Aim for >= _MIN_TILES grid steps so the parallel axis can shard.
        tr_tiles = max(_SUBLANES,
                       _round_down(pl.cdiv(R, _MIN_TILES), _SUBLANES))
        TR = max(_SUBLANES,
                 min(tr_vmem, tr_tiles,
                     max(_SUBLANES, _round_down(block_rows, _SUBLANES)),
                     _round_up(R, _SUBLANES)))
    return C, R, TR, aligned


def get_geq(w, rho, E, T, qx_eq, qy_eq, Rxx_eq, Rxy_eq, Ryy_eq, ex, ey,
            *, block_rows=512, lane_cols=1024):
    """Pallas implementation of Get_Geq.forward.

    w:            (9, 1, 1) or (9,) float32
    rho..Ryy_eq:  (H, W)            float32
    ex, ey:       (9,)              float32 (PyTorch views them to (9,1,1))
    returns Geq:  (9, H, W)         float32
    """
    H, W = rho.shape
    N = H * W

    vmem_cap = _vmem_capacity_bytes()
    C, R, TR, aligned = _choose_layout(N, block_rows, lane_cols,
                                       vmem_budget=int(0.55 * vmem_cap))
    N_pad = R * C
    grid = (pl.cdiv(R, TR),)

    if aligned:
        # Zero-copy: contiguous reshape only, no padding / no extra HBM pass.
        def _prep(f, fill):
            return jnp.reshape(f.astype(jnp.float32), (R, C))
    else:
        def _prep(f, fill):
            flat = jnp.reshape(f, (-1,)).astype(jnp.float32)
            flat = jnp.pad(flat, (0, N_pad - N), constant_values=fill)
            return flat.reshape(R, C)

    fields = (
        _prep(rho, 0.0), _prep(E, 0.0),
        _prep(T, 1.0),                 # pad T with 1.0 so dead lanes don't divide by 0
        _prep(qx_eq, 0.0), _prep(qy_eq, 0.0),
        _prep(Rxx_eq, 0.0), _prep(Rxy_eq, 0.0), _prep(Ryy_eq, 0.0),
    )

    field_spec = pl.BlockSpec((TR, C), lambda i: (i, 0))
    out_spec = pl.BlockSpec((_Q, TR, C), lambda i: (0, i, 0))
    smem_spec = pl.BlockSpec(memory_space=pltpu.MemorySpace.SMEM)
    out_shape = jax.ShapeDtypeStruct((_Q, R, C), jnp.float32)

    # Honest VMEM estimate: dbl-buffered IO + invariant temporaries, capped
    # at 90% of this chip's physical VMEM.
    blk_bytes = TR * C * 4
    est = (2 * _N_FIELDS + 2 * _Q + 8) * blk_bytes
    vmem_limit = int(min(max(est + (2 << 20), 16 << 20), int(0.9 * vmem_cap)))
    compiler_params = pltpu.CompilerParams(
        dimension_semantics=("parallel",),
        vmem_limit_bytes=vmem_limit)

    w_c = _concrete_f32(w, _Q)
    ex_c = _concrete_f32(ex, _Q)
    ey_c = _concrete_f32(ey, _Q)

    if w_c is not None and ex_c is not None and ey_c is not None:
        out = pl.pallas_call(
            _make_static_kernel(w_c, ex_c, ey_c),
            out_shape=out_shape,
            grid_spec=pltpu.PrefetchScalarGridSpec(
                num_scalar_prefetch=0,
                grid=grid,
                in_specs=[field_spec] * len(fields),
                out_specs=out_spec),
            compiler_params=compiler_params,
        )(*fields)
    else:
        # Traced w/ex/ey (e.g. under jit): per-direction scalars from SMEM.
        out = pl.pallas_call(
            _dynamic_kernel,
            out_shape=out_shape,
            grid_spec=pltpu.PrefetchScalarGridSpec(
                num_scalar_prefetch=0,
                grid=grid,
                in_specs=[smem_spec] * 3 + [field_spec] * len(fields),
                out_specs=out_spec),
            compiler_params=compiler_params,
        )(jnp.reshape(w, (_Q,)).astype(jnp.float32),
          jnp.reshape(ex, (_Q,)).astype(jnp.float32),
          jnp.reshape(ey, (_Q,)).astype(jnp.float32),
          *fields)

    if N_pad == N:
        return out.reshape(_Q, H, W)           # free reshape, no extra copy
    return out.reshape(_Q, N_pad)[:, :N].reshape(_Q, H, W)


def _reference(w, rho, E, T, qx_eq, qy_eq, Rxx_eq, Rxy_eq, Ryy_eq, ex, ey):
    # Pure-JAX reference mirroring the PyTorch forward (broadcast (9,1,1) x (H,W)).
    ex = jnp.reshape(ex, (9, 1, 1))
    ey = jnp.reshape(ey, (9, 1, 1))
    w = jnp.reshape(w, (9, 1, 1))
    term1 = 2.0 * rho * E
    term2 = (qx_eq * ex + qy_eq * ey) / T
    term3 = ((Rxx_eq - 2 * rho * E * T) * (ex ** 2 - T)
             + (Ryy_eq - 2 * rho * E * T) * (ey ** 2 - T)
             + Rxy_eq * (ex * ey)) / (2 * T ** 2)
    return w * (term1 + term2 + term3)


def _run_case(H, W, key):
    keys = jax.random.split(key, 8)

    # D2Q9 constants (deterministic, standard lattice).
    w = jnp.array([4.0 / 9.0] + [1.0 / 9.0] * 4 + [1.0 / 36.0] * 4,
                  dtype=jnp.float32).reshape(9, 1, 1)
    ex = jnp.array([0, 1, 0, -1, 0, 1, -1, -1, 1], dtype=jnp.float32)
    ey = jnp.array([0, 0, 1, 0, -1, 1, 1, -1, -1], dtype=jnp.float32)

    rho = 1.0 + 0.05 * jax.random.normal(keys[0], (H, W), jnp.float32)
    E = 0.5 + 0.05 * jax.random.normal(keys[1], (H, W), jnp.float32)
    T = 0.3 + 0.02 * jax.random.normal(keys[2], (H, W), jnp.float32)  # keep T > 0
    qx_eq = 0.1 * jax.random.normal(keys[3], (H, W), jnp.float32)
    qy_eq = 0.1 * jax.random.normal(keys[4], (H, W), jnp.float32)
    Rxx_eq = 0.1 * jax.random.normal(keys[5], (H, W), jnp.float32)
    Rxy_eq = 0.1 * jax.random.normal(keys[6], (H, W), jnp.float32)
    Ryy_eq = 0.1 * jax.random.normal(keys[7], (H, W), jnp.float32)

    geq = get_geq(w, rho, E, T, qx_eq, qy_eq, Rxx_eq, Rxy_eq, Ryy_eq, ex, ey)
    geq = jax.block_until_ready(geq)

    ref = _reference(w, rho, E, T, qx_eq, qy_eq, Rxx_eq, Rxy_eq, Ryy_eq, ex, ey)
    assert geq.shape == (9, H, W)
    assert jnp.allclose(geq, ref, atol=1e-5, rtol=1e-5)


if __name__ == "__main__":
    key = jax.random.PRNGKey(0)
    k1, k2 = jax.random.split(key)
    _run_case(16, 16, k1)   # aligned (zero-copy) path: H*W multiple of 128
    _run_case(13, 17, k2)   # ragged path: exercises the padded fallback
    print("KERNEL_OK")
</pallas_src>

<mosaic_0001>
module attributes {stable_mosaic.version = 11 : i64} {
  func.func @kernel(%arg0: i32, %arg1: memref<1x256xf32, #tpu.memory_space<vmem>>, %arg2: memref<1x256xf32, #tpu.memory_space<vmem>>, %arg3: memref<1x256xf32, #tpu.memory_space<vmem>>, %arg4: memref<1x256xf32, #tpu.memory_space<vmem>>, %arg5: memref<1x256xf32, #tpu.memory_space<vmem>>, %arg6: memref<1x256xf32, #tpu.memory_space<vmem>>, %arg7: memref<1x256xf32, #tpu.memory_space<vmem>>, %arg8: memref<1x256xf32, #tpu.memory_space<vmem>>, %arg9: memref<9x1x256xf32, #tpu.memory_space<vmem>>) attributes {dimension_semantics = [#tpu.dimension_semantics<parallel>], iteration_bounds = array<i64: 1>, scalar_prefetch = 0 : i64, scratch_operands = 0 : i64, tpu.core_type = #tpu.core_type<tc>, window_params = [{transform_indices = @transform_0, window_bounds = array<i64: 1, 256>}, {transform_indices = @transform_1, window_bounds = array<i64: 1, 256>}, {transform_indices = @transform_2, window_bounds = array<i64: 1, 256>}, {transform_indices = @transform_3, window_bounds = array<i64: 1, 256>}, {transform_indices = @transform_4, window_bounds = array<i64: 1, 256>}, {transform_indices = @transform_5, window_bounds = array<i64: 1, 256>}, {transform_indices = @transform_6, window_bounds = array<i64: 1, 256>}, {transform_indices = @transform_7, window_bounds = array<i64: 1, 256>}, {transform_indices = @transform_8, window_bounds = array<i64: 9, 1, 256>}]} {
    %c0 = arith.constant 0 : index
    %c0_0 = arith.constant 0 : index
    %0 = vector.load %arg1[%c0, %c0_0] : memref<1x256xf32, #tpu.memory_space<vmem>>, vector<1x256xf32>
    %c0_1 = arith.constant 0 : index
    %c0_2 = arith.constant 0 : index
    %1 = vector.load %arg2[%c0_1, %c0_2] : memref<1x256xf32, #tpu.memory_space<vmem>>, vector<1x256xf32>
    %c0_3 = arith.constant 0 : index
    %c0_4 = arith.constant 0 : index
    %2 = vector.load %arg3[%c0_3, %c0_4] : memref<1x256xf32, #tpu.memory_space<vmem>>, vector<1x256xf32>
    %c0_5 = arith.constant 0 : index
    %c0_6 = arith.constant 0 : index
    %3 = vector.load %arg4[%c0_5, %c0_6] : memref<1x256xf32, #tpu.memory_space<vmem>>, vector<1x256xf32>
    %c0_7 = arith.constant 0 : index
    %c0_8 = arith.constant 0 : index
    %4 = vector.load %arg5[%c0_7, %c0_8] : memref<1x256xf32, #tpu.memory_space<vmem>>, vector<1x256xf32>
    %c0_9 = arith.constant 0 : index
    %c0_10 = arith.constant 0 : index
    %5 = vector.load %arg6[%c0_9, %c0_10] : memref<1x256xf32, #tpu.memory_space<vmem>>, vector<1x256xf32>
    %c0_11 = arith.constant 0 : index
    %c0_12 = arith.constant 0 : index
    %6 = vector.load %arg7[%c0_11, %c0_12] : memref<1x256xf32, #tpu.memory_space<vmem>>, vector<1x256xf32>
    %c0_13 = arith.constant 0 : index
    %c0_14 = arith.constant 0 : index
    %7 = vector.load %arg8[%c0_13, %c0_14] : memref<1x256xf32, #tpu.memory_space<vmem>>, vector<1x256xf32>
    %cst = arith.constant 1.000000e+00 : f32
    %8 = vector.broadcast %cst : f32 to vector<1x256xf32>
    %9 = arith.divf %8, %2 : vector<1x256xf32>
    %cst_15 = arith.constant 5.000000e-01 : f32
    %10 = vector.broadcast %cst_15 : f32 to vector<1x256xf32>
    %11 = arith.mulf %10, %9 : vector<1x256xf32>
    %12 = arith.mulf %11, %9 : vector<1x256xf32>
    %cst_16 = arith.constant 2.000000e+00 : f32
    %13 = vector.broadcast %cst_16 : f32 to vector<1x256xf32>
    %14 = arith.mulf %13, %0 : vector<1x256xf32>
    %15 = arith.mulf %14, %1 : vector<1x256xf32>
    %16 = arith.mulf %15, %2 : vector<1x256xf32>
    %17 = arith.subf %5, %16 : vector<1x256xf32>
    %18 = arith.mulf %17, %12 : vector<1x256xf32>
    %19 = arith.subf %7, %16 : vector<1x256xf32>
    %20 = arith.mulf %19, %12 : vector<1x256xf32>
    %21 = arith.mulf %6, %12 : vector<1x256xf32>
    %22 = arith.mulf %3, %9 : vector<1x256xf32>
    %23 = arith.mulf %4, %9 : vector<1x256xf32>
    %24 = arith.addf %18, %20 : vector<1x256xf32>
    %25 = arith.mulf %2, %24 : vector<1x256xf32>
    %26 = arith.subf %15, %25 : vector<1x256xf32>
    %cst_17 = arith.constant 0.444444448 : f32
    %27 = vector.broadcast %cst_17 : f32 to vector<1x256xf32>
    %28 = arith.mulf %27, %26 : vector<1x256xf32>
    %c0_18 = arith.constant 0 : index
    %c0_19 = arith.constant 0 : index
    %c0_20 = arith.constant 0 : index
    %29 = vector.load %arg9[%c0_18, %c0_19, %c0_20] : memref<9x1x256xf32, #tpu.memory_space<vmem>>, vector<1x1x256xf32>
    %30 = vector.shape_cast %29 : vector<1x1x256xf32> to vector<1x256xf32>
    %31 = vector.shape_cast %28 : vector<1x256xf32> to vector<1x1x256xf32>
    tpu.vector_store %arg9[%c0_18, %c0_19, %c0_20], %31 {strides = array<i32>} : memref<9x1x256xf32, #tpu.memory_space<vmem>>, vector<1x1x256xf32>,
    %32 = arith.addf %26, %22 : vector<1x256xf32>
    %33 = arith.addf %32, %18 : vector<1x256xf32>
    %cst_21 = arith.constant 0.111111112 : f32
    %34 = vector.broadcast %cst_21 : f32 to vector<1x256xf32>
    %35 = arith.mulf %34, %33 : vector<1x256xf32>
    %c1 = arith.constant 1 : index
    %c0_22 = arith.constant 0 : index
    %c0_23 = arith.constant 0 : index
    %36 = vector.load %arg9[%c1, %c0_22, %c0_23] : memref<9x1x256xf32, #tpu.memory_space<vmem>>, vector<1x1x256xf32>
    %37 = vector.shape_cast %36 : vector<1x1x256xf32> to vector<1x256xf32>
    %38 = vector.shape_cast %35 : vector<1x256xf32> to vector<1x1x256xf32>
    tpu.vector_store %arg9[%c1, %c0_22, %c0_23], %38 {strides = array<i32>} : memref<9x1x256xf32, #tpu.memory_space<vmem>>, vector<1x1x256xf32>,
    %39 = arith.addf %26, %23 : vector<1x256xf32>
    %40 = arith.addf %39, %20 : vector<1x256xf32>
    %cst_24 = arith.constant 0.111111112 : f32
    %41 = vector.broadcast %cst_24 : f32 to vector<1x256xf32>
    %42 = arith.mulf %41, %40 : vector<1x256xf32>
    %c2 = arith.constant 2 : index
    %c0_25 = arith.constant 0 : index
    %c0_26 = arith.constant 0 : index
    %43 = vector.load %arg9[%c2, %c0_25, %c0_26] : memref<9x1x256xf32, #tpu.memory_space<vmem>>, vector<1x1x256xf32>
    %44 = vector.shape_cast %43 : vector<1x1x256xf32> to vector<1x256xf32>
    %45 = vector.shape_cast %42 : vector<1x256xf32> to vector<1x1x256xf32>
    tpu.vector_store %arg9[%c2, %c0_25, %c0_26], %45 {strides = array<i32>} : memref<9x1x256xf32, #tpu.memory_space<vmem>>, vector<1x1x256xf32>,
    %46 = arith.subf %26, %22 : vector<1x256xf32>
    %47 = arith.addf %46, %18 : vector<1x256xf32>
    %cst_27 = arith.constant 0.111111112 : f32
    %48 = vector.broadcast %cst_27 : f32 to vector<1x256xf32>
    %49 = arith.mulf %48, %47 : vector<1x256xf32>
    %c3 = arith.constant 3 : index
    %c0_28 = arith.constant 0 : index
    %c0_29 = arith.constant 0 : index
    %50 = vector.load %arg9[%c3, %c0_28, %c0_29] : memref<9x1x256xf32, #tpu.memory_space<vmem>>, vector<1x1x256xf32>
    %51 = vector.shape_cast %50 : vector<1x1x256xf32> to vector<1x256xf32>
    %52 = vector.shape_cast %49 : vector<1x256xf32> to vector<1x1x256xf32>
    tpu.vector_store %arg9[%c3, %c0_28, %c0_29], %52 {strides = array<i32>} : memref<9x1x256xf32, #tpu.memory_space<vmem>>, vector<1x1x256xf32>,
    %53 = arith.subf %26, %23 : vector<1x256xf32>
    %54 = arith.addf %53, %20 : vector<1x256xf32>
    %cst_30 = arith.constant 0.111111112 : f32
    %55 = vector.broadcast %cst_30 : f32 to vector<1x256xf32>
    %56 = arith.mulf %55, %54 : vector<1x256xf32>
    %c4 = arith.constant 4 : index
    %c0_31 = arith.constant 0 : index
    %c0_32 = arith.constant 0 : index
    %57 = vector.load %arg9[%c4, %c0_31, %c0_32] : memref<9x1x256xf32, #tpu.memory_space<vmem>>, vector<1x1x256xf32>
    %58 = vector.shape_cast %57 : vector<1x1x256xf32> to vector<1x256xf32>
    %59 = vector.shape_cast %56 : vector<1x256xf32> to vector<1x1x256xf32>
    tpu.vector_store %arg9[%c4, %c0_31, %c0_32], %59 {strides = array<i32>} : memref<9x1x256xf32, #tpu.memory_space<vmem>>, vector<1x1x256xf32>,
    %60 = arith.addf %26, %22 : vector<1x256xf32>
    %61 = arith.addf %60, %23 : vector<1x256xf32>
    %62 = arith.addf %61, %18 : vector<1x256xf32>
    %63 = arith.addf %62, %20 : vector<1x256xf32>
    %64 = arith.addf %63, %21 : vector<1x256xf32>
    %cst_33 = arith.constant 0.027777778 : f32
    %65 = vector.broadcast %cst_33 : f32 to vector<1x256xf32>
    %66 = arith.mulf %65, %64 : vector<1x256xf32>
    %c5 = arith.constant 5 : index
    %c0_34 = arith.constant 0 : index
    %c0_35 = arith.constant 0 : index
    %67 = vector.load %arg9[%c5, %c0_34, %c0_35] : memref<9x1x256xf32, #tpu.memory_space<vmem>>, vector<1x1x256xf32>
    %68 = vector.shape_cast %67 : vector<1x1x256xf32> to vector<1x256xf32>
    %69 = vector.shape_cast %66 : vector<1x256xf32> to vector<1x1x256xf32>
    tpu.vector_store %arg9[%c5, %c0_34, %c0_35], %69 {strides = array<i32>} : memref<9x1x256xf32, #tpu.memory_space<vmem>>, vector<1x1x256xf32>,
    %70 = arith.subf %26, %22 : vector<1x256xf32>
    %71 = arith.addf %70, %23 : vector<1x256xf32>
    %72 = arith.addf %71, %18 : vector<1x256xf32>
    %73 = arith.addf %72, %20 : vector<1x256xf32>
    %74 = arith.subf %73, %21 : vector<1x256xf32>
    %cst_36 = arith.constant 0.027777778 : f32
    %75 = vector.broadcast %cst_36 : f32 to vector<1x256xf32>
    %76 = arith.mulf %75, %74 : vector<1x256xf32>
    %c6 = arith.constant 6 : index
    %c0_37 = arith.constant 0 : index
    %c0_38 = arith.constant 0 : index
    %77 = vector.load %arg9[%c6, %c0_37, %c0_38] : memref<9x1x256xf32, #tpu.memory_space<vmem>>, vector<1x1x256xf32>
    %78 = vector.shape_cast %77 : vector<1x1x256xf32> to vector<1x256xf32>
    %79 = vector.shape_cast %76 : vector<1x256xf32> to vector<1x1x256xf32>
    tpu.vector_store %arg9[%c6, %c0_37, %c0_38], %79 {strides = array<i32>} : memref<9x1x256xf32, #tpu.memory_space<vmem>>, vector<1x1x256xf32>,
    %80 = arith.subf %26, %22 : vector<1x256xf32>
    %81 = arith.subf %80, %23 : vector<1x256xf32>
    %82 = arith.addf %81, %18 : vector<1x256xf32>
    %83 = arith.addf %82, %20 : vector<1x256xf32>
    %84 = arith.addf %83, %21 : vector<1x256xf32>
    %cst_39 = arith.constant 0.027777778 : f32
    %85 = vector.broadcast %cst_39 : f32 to vector<1x256xf32>
    %86 = arith.mulf %85, %84 : vector<1x256xf32>
    %c7 = arith.constant 7 : index
    %c0_40 = arith.constant 0 : index
    %c0_41 = arith.constant 0 : index
    %87 = vector.load %arg9[%c7, %c0_40, %c0_41] : memref<9x1x256xf32, #tpu.memory_space<vmem>>, vector<1x1x256xf32>
    %88 = vector.shape_cast %87 : vector<1x1x256xf32> to vector<1x256xf32>
    %89 = vector.shape_cast %86 : vector<1x256xf32> to vector<1x1x256xf32>
    tpu.vector_store %arg9[%c7, %c0_40, %c0_41], %89 {strides = array<i32>} : memref<9x1x256xf32, #tpu.memory_space<vmem>>, vector<1x1x256xf32>,
    %90 = arith.addf %26, %22 : vector<1x256xf32>
    %91 = arith.subf %90, %23 : vector<1x256xf32>
    %92 = arith.addf %91, %18 : vector<1x256xf32>
    %93 = arith.addf %92, %20 : vector<1x256xf32>
    %94 = arith.subf %93, %21 : vector<1x256xf32>
    %cst_42 = arith.constant 0.027777778 : f32
    %95 = vector.broadcast %cst_42 : f32 to vector<1x256xf32>
    %96 = arith.mulf %95, %94 : vector<1x256xf32>
    %c8 = arith.constant 8 : index
    %c0_43 = arith.constant 0 : index
    %c0_44 = arith.constant 0 : index
    %97 = vector.load %arg9[%c8, %c0_43, %c0_44] : memref<9x1x256xf32, #tpu.memory_space<vmem>>, vector<1x1x256xf32>
    %98 = vector.shape_cast %97 : vector<1x1x256xf32> to vector<1x256xf32>
    %99 = vector.shape_cast %96 : vector<1x256xf32> to vector<1x1x256xf32>
    tpu.vector_store %arg9[%c8, %c0_43, %c0_44], %99 {strides = array<i32>} : memref<9x1x256xf32, #tpu.memory_space<vmem>>, vector<1x1x256xf32>,
    return
  }
  func.func @transform_0(%arg0: i32) -> (i32, i32) {
    %c0_i32 = arith.constant 0 : i32
    %c0_i32_0 = arith.constant 0 : i32
    return %arg0, %c0_i32 : i32, i32
  }
  func.func @transform_1(%arg0: i32) -> (i32, i32) {
    %c0_i32 = arith.constant 0 : i32
    %c0_i32_0 = arith.constant 0 : i32
    return %arg0, %c0_i32 : i32, i32
  }
  func.func @transform_2(%arg0: i32) -> (i32, i32) {
    %c0_i32 = arith.constant 0 : i32
    %c0_i32_0 = arith.constant 0 : i32
    return %arg0, %c0_i32 : i32, i32
  }
  func.func @transform_3(%arg0: i32) -> (i32, i32) {
    %c0_i32 = arith.constant 0 : i32
    %c0_i32_0 = arith.constant 0 : i32
    return %arg0, %c0_i32 : i32, i32
  }
  func.func @transform_4(%arg0: i32) -> (i32, i32) {
    %c0_i32 = arith.constant 0 : i32
    %c0_i32_0 = arith.constant 0 : i32
    return %arg0, %c0_i32 : i32, i32
  }
  func.func @transform_5(%arg0: i32) -> (i32, i32) {
    %c0_i32 = arith.constant 0 : i32
    %c0_i32_0 = arith.constant 0 : i32
    return %arg0, %c0_i32 : i32, i32
  }
  func.func @transform_6(%arg0: i32) -> (i32, i32) {
    %c0_i32 = arith.constant 0 : i32
    %c0_i32_0 = arith.constant 0 : i32
    return %arg0, %c0_i32 : i32, i32
  }
  func.func @transform_7(%arg0: i32) -> (i32, i32) {
    %c0_i32 = arith.constant 0 : i32
    %c0_i32_0 = arith.constant 0 : i32
    return %arg0, %c0_i32 : i32, i32
  }
  func.func @transform_8(%arg0: i32) -> (i32, i32, i32) {
    %c0_i32 = arith.constant 0 : i32
    %c0_i32_0 = arith.constant 0 : i32
    %c0_i32_1 = arith.constant 0 : i32
    return %c0_i32, %arg0, %c0_i32_0 : i32, i32, i32
  }
}

</mosaic_0001>

<bundles_post_ra>
// kernel: tpu_custom_call.1
= control target key start
LH: loop header
LB: loop body
LE: loop exit
PB: predicated region body
PF: predicated region fallthrough
CT: control target
= control target key end

     0   :  { %13 = vsyncpa [#allocation3], 0  ;;  %s475_s0 = inlined_call_operand.hbm [shape: f32[1,256], index: 0, kind: input, shape index: {}]   ;;  %s476_s1 = inlined_call_operand.hbm [shape: f32[1,256], index: 1, kind: input, shape index: {}]   ;;  %s477_s2 = inlined_call_operand.hbm [shape: f32[1,256], index: 2, kind: input, shape index: {}]   ;;  %s478_s3 = inlined_call_operand.vmem [shape: f32[1,256], index: 3, kind: input, shape index: {}]   ;;  %s479_s4 = inlined_call_operand.hbm [shape: f32[1,256], index: 4, kind: input, shape index: {}]   ;;  %s480_s5 = inlined_call_operand.vmem [shape: f32[1,256], index: 5, kind: input, shape index: {}]   ;;  %s481_s6 = inlined_call_operand.hbm [shape: f32[1,256], index: 6, kind: input, shape index: {}]   ;;  %s482_s7 = inlined_call_operand.vmem [shape: f32[1,256], index: 7, kind: input, shape index: {}]   ;;  %s483_s8 = inlined_call_operand.hbm [shape: f32[9,1,256], index: 8, kind: output, shape index: {}]  }
   0x1   :  { %14 = vsyncpa [#allocation6], 0 }
   0x2   :  { %15 = vsyncpa [#allocation9], 0  ;;  %s33_s29 = sshll.u32 %s476_s1, 4  ;;  %s34_s29 = int_to_ptr.hbm [resolvable:$true] %s33_s29 }
   0x3   :  { %16 = vsyncpa [#allocation4], 0  ;;  %s373_s30 = smov [#allocation5]   ;;  %s57_s12 = sshll.u32 %s479_s4, 4  ;;  %s58_s12 = int_to_ptr.hbm [resolvable:$true] %s57_s12 }
   0x4   :  { %s35_s9 = sshll.u32 %s373_s30, 4  ;;  %s374_s13 = smov [#allocation8]   ;;  %s36_s9 = int_to_ptr.vmem [resolvable:$true] %s35_s9 }
   0x5   :  { %38 = dma.hbm_to_vmem [thread:$0]  %s34_s29, 32, %s36_s9, [#allocation6]  }
   0x6   :  { %s59_s14 = sshll.u32 %s374_s13, 4  ;;  %s22_s17 = sshll.u32 %s475_s0, 4  ;;  %s60_s14 = int_to_ptr.vmem [resolvable:$true] %s59_s14  ;;  %s23_s17 = int_to_ptr.hbm [resolvable:$true] %s22_s17 }
   0x7   :  { %62 = dma.hbm_to_vmem [thread:$0]  %s58_s12, 32, %s60_s14, [#allocation9]  }
   0x8   :  { %s44_s19 = sshll.u32 %s477_s2, 4  ;;  %s375_s20 = smov [#allocation2]   ;;  %s45_s19 = int_to_ptr.hbm [resolvable:$true] %s44_s19 }
   0x9   :  { %s24_s21 = sshll.u32 %s375_s20, 4  ;;  %s376_s4 = smov [#allocation7]   ;;  %s25_s21 = int_to_ptr.vmem [resolvable:$true] %s24_s21 }
   0xa   :  { %27 = dma.hbm_to_vmem [thread:$0]  %s23_s17, 32, %s25_s21, [#allocation3]  }
   0xb   :  { %s46_s22 = sshll.u32 %s376_s4, 4  ;;  %s70_s25 = sshll.u32 %s481_s6, 4  ;;  %s47_s22 = int_to_ptr.vmem [resolvable:$true] %s46_s22  ;;  %s71_s25 = int_to_ptr.hbm [resolvable:$true] %s70_s25 }
   0xc   :  { %49 = dma.hbm_to_vmem [thread:$0]  %s45_s19, 32, %s47_s22, [#allocation6]  }
   0xd   :  { %s377_s0 = smov [#allocation10]  }
   0xe   :  { %s72_s26 = sshll.u32 %s377_s0, 4  ;;  %s73_s26 = int_to_ptr.vmem [resolvable:$true] %s72_s26 }
   0xf   :  { %75 = dma.hbm_to_vmem [thread:$0]  %s71_s25, 32, %s73_s26, [#allocation9]  }
  0x10   :  { %365 = dma.done.wait [#allocation3], 32  }
  0x11   :  { %366 = vsyncadd [#allocation3], 4294967264 }
  0x12   :  { %367 = dma.done.wait [#allocation6], 64  }
  0x13   :  { %368 = vsyncadd [#allocation6], 4294967232 }
  0x14   :  { %369 = dma.done.wait [#allocation9], 64  }
  0x15   :  { %370 = vsyncadd [#allocation9], 4294967232  ;;  %v100_v0 = vld [vmem:[#allocation7] sm:$0x3]  ;;  %v98_v1 = vld [vmem:[#allocation2] sm:$0x3]  ;;  %v137_v26 = vlaneseq }
  0x16   :  { %219 = vrcp.f32 %v100_v0  ;;  %v123_v2 = vmul.f32 2.0, %v98_v1  ;;  %v99_v4 = vld [vmem:[#allocation5] sm:$0x3]  ;;  %vm111_vm0 = vweird.f32 %v100_v0  ;;  %v117_v6 = vand.u32 2147483648, %v100_v0  ;;  %v103_v14 = vld [vmem:[%s480_s5] sm:$0x3] }
  0x17   :  { %v115_v8 = vand.u32 2147483647, %v100_v0  ;;  %v105_v15 = vld [vmem:[%s482_s7] sm:$0x3]  ;;  %v102_v27 = vld [vmem:[#allocation8] sm:$0x3] }
  0x18   :  { %v124_v9 = vmul.f32 %v123_v2, %v99_v4  ;;  %v118_v11 = vor.u32 1.1754944e-38, %v117_v6  ;;  %v101_v24 = vld [vmem:[%s478_s3] sm:$0x3]  ;;  %v104_v32 = vld [vmem:[#allocation10] sm:$0x3]  ;;  %vm450_vm4 = vcmp.lt.s32.totalorder %v137_v26, 256 }
  0x19   :  { %vm116_vm3 = vcmp.eq.f32.partialorder %v115_v8, 8.507059e+37  ;;  %s378_s3 = smov [#allocation11]   ;;  %s196_s10 = sshll.u32 %s483_s8, 4  ;;  %s197_s10 = int_to_ptr.hbm [resolvable:$true] %s196_s10 }
  0x1a   :  { %v125_v13 = vmul.f32 %v124_v9, %v100_v0  ;;  %s194_s5 = sshll.u32 %s378_s3, 4  ;;  %s379_s11 = smov 32   ;;  %s195_s5 = int_to_ptr.vmem [resolvable:$true] %s194_s5 }
  0x1b   :  { %s380_s8 = smov 2  }
  0x1c   :  { %v220_v3 = vpop.eup %219  ;;  %v126_v19 = vsub.f32 %v103_v14, %v125_v13  ;;  %v128_v20 = vsub.f32 %v105_v15, %v125_v13 }
  0x1d   :  { %v107_v5 = vmul.f32 %v220_v3, %v100_v0  ;;  %vm112_vm1 = vweird.f32 %v220_v3 }
  0x1e   :  { %vm113_vm2 = vmor %vm111_vm0, %vm112_vm1 }
  0x1f   :  { %v108_v7 = vsub.f32 1.0, %v107_v5 }
  0x21   :  { %v109_v10 = vmul.f32 %v220_v3, %v108_v7 }
  0x23   :  { %v110_v12 = vadd.f32 %v220_v3, %v109_v10 }
  0x25   :  { %v114_v16 = vsel %vm113_vm2, %v220_v3, %v110_v12 }
  0x26   :  { %v119_v17 = vsel %vm116_vm3, %v118_v11, %v114_v16 }
  0x27   :  { %v121_v18 = vmul.f32 0.5, %v119_v17  ;;  %v131_v29 = vmul.f32 %v119_v17, %v101_v24  ;;  %v132_v31 = vmul.f32 %v119_v17, %v102_v27 }
  0x29   :  { %v122_v21 = vmul.f32 %v121_v18, %v119_v17 }
  0x2b   :  { %v127_v22 = vmul.f32 %v126_v19, %v122_v21  ;;  %v129_v23 = vmul.f32 %v128_v20, %v122_v21  ;;  %v130_v39 = vmul.f32 %v122_v21, %v104_v32 }
  0x2d   :  { %v133_v25 = vadd.f32 %v129_v23, %v127_v22 }
  0x2f   :  { %v134_v28 = vmul.f32 %v133_v25, %v100_v0 }
  0x31   :  { %v135_v30 = vsub.f32 %v124_v9, %v134_v28 }
  0x33   :  { %v136_v34 = vmul.f32 0.44444445, %v135_v30  ;;  %v142_v35 = vadd.f32 %v135_v30, %v131_v29  ;;  %v147_v36 = vadd.f32 %v135_v30, %v132_v31  ;;  %v152_v37 = vsub.f32 %v135_v30, %v131_v29 }
  0x34   :  { %v157_v38 = vsub.f32 %v135_v30, %v132_v31 }
  0x35   :  { %141 = vst.msk [vmem:[#allocation11] sm:$0x3] %vm450_vm4, %v136_v34  ;;  %v143_v40 = vadd.f32 %v142_v35, %v127_v22  ;;  %v148_v41 = vadd.f32 %v147_v36, %v129_v23  ;;  %v153_v42 = vadd.f32 %v152_v37, %v127_v22  ;;  %v162_v43 = vadd.f32 %v142_v35, %v132_v31 }
  0x36   :  { %v158_v44 = vadd.f32 %v157_v38, %v129_v23  ;;  %v169_v45 = vadd.f32 %v152_v37, %v132_v31  ;;  %v176_v46 = vsub.f32 %v152_v37, %v132_v31  ;;  %v183_v47 = vsub.f32 %v142_v35, %v132_v31 }
  0x37   :  { %v144_v48 = vmul.f32 0.11111111, %v143_v40  ;;  %v149_v49 = vmul.f32 0.11111111, %v148_v41  ;;  %v154_v50 = vmul.f32 0.11111111, %v153_v42  ;;  %v163_v51 = vadd.f32 %v162_v43, %v127_v22 }
  0x38   :  { %v159_v52 = vmul.f32 0.11111111, %v158_v44  ;;  %v170_v53 = vadd.f32 %v169_v45, %v127_v22  ;;  %v177_v54 = vadd.f32 %v176_v46, %v127_v22  ;;  %v184_v55 = vadd.f32 %v183_v47, %v127_v22 }
  0x39   :  { %146 = vst.msk [vmem:[#allocation11 + $0x2] sm:$0x3] %vm450_vm4, %v144_v48  ;;  %v164_v56 = vadd.f32 %v163_v51, %v129_v23 }
  0x3a   :  { %151 = vst.msk [vmem:[#allocation11 + $0x4] sm:$0x3] %vm450_vm4, %v149_v49  ;;  %v171_v57 = vadd.f32 %v170_v53, %v129_v23  ;;  %v178_v58 = vadd.f32 %v177_v54, %v129_v23  ;;  %v185_v59 = vadd.f32 %v184_v55, %v129_v23 }
  0x3b   :  { %156 = vst.msk [vmem:[#allocation11 + $0x6] sm:$0x3] %vm450_vm4, %v154_v50  ;;  %v165_v60 = vadd.f32 %v164_v56, %v130_v39 }
  0x3c   :  { %161 = vst.msk [vmem:[#allocation11 + $0x8] sm:$0x3] %vm450_vm4, %v159_v52  ;;  %v172_v61 = vsub.f32 %v171_v57, %v130_v39  ;;  %v179_v62 = vadd.f32 %v178_v58, %v130_v39  ;;  %v186_v63 = vsub.f32 %v185_v59, %v130_v39 }
  0x3d   :  { %v166_v0 = vmul.f32 0.027777778, %v165_v60 }
  0x3e   :  { %v173_v1 = vmul.f32 0.027777778, %v172_v61  ;;  %v180_v2 = vmul.f32 0.027777778, %v179_v62  ;;  %v187_v3 = vmul.f32 0.027777778, %v186_v63 }
  0x3f   :  { %168 = vst.msk [vmem:[#allocation11 + $0xa] sm:$0x3] %vm450_vm4, %v166_v0 }
  0x40   :  { %175 = vst.msk [vmem:[#allocation11 + $0xc] sm:$0x3] %vm450_vm4, %v173_v1 }
  0x41   :  { %182 = vst.msk [vmem:[#allocation11 + $0xe] sm:$0x3] %vm450_vm4, %v180_v2 }
  0x42   :  { %189 = vst.msk [vmem:[#allocation11 + $0x10] sm:$0x3] %vm450_vm4, %v187_v3 }
  0x43   :  { %202 = dma.vmem_to_hbm [thread:$0]  %s195_s5, 288, %s197_s10, [#allocation4], %s379_s11, %s379_s11, %s380_s8  }
  0x44   :  { %371 = dma.done.wait [#allocation4], 288  }
  0x45   :  { %372 = vsyncadd [#allocation4], 4294967008 }
  0x46   :  { %207 = vsyncpa [#allocation3], 1 }
  0x47   :  { %208 = vsyncpa [#allocation6], 1 }
  0x48   :  { %209 = vsyncpa [#allocation9], 1 }
  0x49   :  { %210 = vsyncpa [#allocation4], 1 }

</bundles_post_ra>
